<compile_context>
chip_gen: v6e
topology: v6e:2x2x1
jax: 0.10.0
libtpu: 0.0.40
codegen_flags: <defaults>
</compile_context>

<pallas_src>
import functools

import jax
import jax.numpy as jnp
from jax.experimental import pallas as pl
from jax.experimental.pallas import tpu as pltpu


def _cdiv(a, b):
    return (a + b - 1) // b


def _round_up(a, b):
    return _cdiv(a, b) * b


def mlp_critic_kernel(obs_ref, w1_ref, b1_ref, w2_ref, b2_ref, w3_ref, b3_ref, out_ref):
    # obs_ref: (obs_dim, TILE_B) bf16 | wN_ref: (out, in) bf16 | bN_ref: (out, 1) f32
    # Hidden layer 1: tanh(W1 @ x + b1) -> (h1, TILE_B), f32 accumulation on MXU.
    h1 = jnp.tanh(
        jnp.dot(w1_ref[...], obs_ref[...], preferred_element_type=jnp.float32)
        + b1_ref[...]
    )
    # Hidden layer 2: tanh(W2 @ h1 + b2) -> (h2, TILE_B)
    h2 = jnp.tanh(
        jnp.dot(w2_ref[...], h1.astype(w2_ref.dtype), preferred_element_type=jnp.float32)
        + b2_ref[...]
    )
    # Output layer (identity activation): (1, TILE_B), lane-dense store.
    v = (
        jnp.dot(w3_ref[...], h2.astype(w3_ref.dtype), preferred_element_type=jnp.float32)
        + b3_ref[...]
    )
    out_ref[...] = v.astype(out_ref.dtype)


@functools.partial(jax.jit, static_argnames=("tile_b",))
def mlp_critic_forward(obs, params, tile_b=512):
    """obs: (B, obs_dim) float32. params: dict of w1,b1,w2,b2,w3,b3 (PyTorch (out,in)/(out,1)).
    Returns (B,) float32, matching torch.squeeze(v_net(obs), -1)."""
    B, obs_dim = obs.shape
    w1, b1 = params["w1"], params["b1"]
    w2, b2 = params["w2"], params["b2"]
    w3, b3 = params["w3"], params["b3"]

    # Tile the batch along lanes; cap the tile so tiny batches don't over-pad.
    tile_b = min(tile_b, _round_up(B, 128))
    b_pad = _round_up(B, tile_b)
    num_tiles = b_pad // tile_b

    # bf16 inputs for HBM bandwidth; f32 accumulation happens inside the kernel.
    obs_t = jnp.pad(obs.T.astype(jnp.bfloat16), ((0, 0), (0, b_pad - B)))
    w1b = w1.astype(jnp.bfloat16)
    w2b = w2.astype(jnp.bfloat16)
    w3b = w3.astype(jnp.bfloat16)

    def wspec(a):
        # Full-array block, same block every grid step -> stays resident in VMEM.
        return pl.BlockSpec(a.shape, lambda i: (0,) * a.ndim)

    out = pl.pallas_call(
        mlp_critic_kernel,
        out_shape=jax.ShapeDtypeStruct((1, b_pad), jnp.float32),
        grid=(num_tiles,),
        in_specs=[
            pl.BlockSpec((obs_dim, tile_b), lambda i: (0, i)),  # batch tile on lanes
            wspec(w1b), wspec(b1),
            wspec(w2b), wspec(b2),
            wspec(w3b), wspec(b3),
        ],
        out_specs=pl.BlockSpec((1, tile_b), lambda i: (0, i)),  # lane-dense output tile
        compiler_params=pltpu.CompilerParams(
            dimension_semantics=("parallel",),  # shards batch across v7x's 2 TCs
        ),
    )(obs_t, w1b, b1, w2b, b2, w3b, b3)

    # torch.squeeze(..., -1): lane-dense (1, B_pad) -> (B,), drop padded columns.
    return out[0, :B]


def init_params(key, obs_dim, hidden_sizes):
    """Deterministic init mimicking torch.nn.Linear default (U[-1/sqrt(fan_in), +]).
    Weights stored PyTorch-style as (out, in); biases as (out, 1)."""
    sizes = [obs_dim] + list(hidden_sizes) + [1]
    params = {}
    for j in range(len(sizes) - 1):
        fan_in, fan_out = sizes[j], sizes[j + 1]
        key, kw, kb = jax.random.split(key, 3)
        bound = 1.0 / jnp.sqrt(jnp.float32(fan_in))
        params[f"w{j + 1}"] = jax.random.uniform(
            kw, (fan_out, fan_in), jnp.float32, -bound, bound
        )
        params[f"b{j + 1}"] = jax.random.uniform(
            kb, (fan_out, 1), jnp.float32, -bound, bound
        )
    return params


def reference_forward_f32(obs, params):
    """Pure-f32 reference of the PyTorch module (x @ W.T + b)."""
    h1 = jnp.tanh(obs @ params["w1"].T + params["b1"].T)
    h2 = jnp.tanh(h1 @ params["w2"].T + params["b2"].T)
    v = h2 @ params["w3"].T + params["b3"].T
    return jnp.squeeze(v, axis=-1)


def reference_forward_bf16(obs, params):
    """Reference with the same bf16-input / f32-accumulate arithmetic as the kernel."""
    bf = jnp.bfloat16
    x = obs.T.astype(bf)
    h1 = jnp.tanh(
        jnp.dot(params["w1"].astype(bf), x, preferred_element_type=jnp.float32)
        + params["b1"]
    )
    h2 = jnp.tanh(
        jnp.dot(params["w2"].astype(bf), h1.astype(bf), preferred_element_type=jnp.float32)
        + params["b2"]
    )
    v = (
        jnp.dot(params["w3"].astype(bf), h2.astype(bf), preferred_element_type=jnp.float32)
        + params["b3"]
    )
    return v[0]


if __name__ == "__main__":
    key = jax.random.PRNGKey(0)
    B, OBS_DIM = 2, 16
    HIDDEN = (32, 32)

    key, kobs = jax.random.split(key)
    obs = jax.random.normal(kobs, (B, OBS_DIM), jnp.float32)
    params = init_params(key, OBS_DIM, HIDDEN)

    v = jax.block_until_ready(mlp_critic_forward(obs, params))
    assert v.shape == (B,), v.shape

    v_bf = reference_forward_bf16(obs, params)
    v_f32 = reference_forward_f32(obs, params)
    assert jnp.allclose(v, v_bf, atol=1e-2, rtol=1e-2), (v, v_bf)
    assert jnp.allclose(v, v_f32, atol=5e-2, rtol=5e-2), (v, v_f32)

    # Larger, ragged batch: exercises the multi-tile grid + lane padding path.
    key, kobs2 = jax.random.split(key)
    B2 = 1000
    obs2 = jax.random.normal(kobs2, (B2, OBS_DIM), jnp.float32)
    v2 = jax.block_until_ready(mlp_critic_forward(obs2, params, tile_b=256))
    assert v2.shape == (B2,), v2.shape
    v2_bf = reference_forward_bf16(obs2, params)
    assert jnp.allclose(v2, v2_bf, atol=1e-2, rtol=1e-2)

    print("KERNEL_OK")
</pallas_src>

<mosaic_0001>
module attributes {stable_mosaic.version = 11 : i64} {
  func.func @mlp_critic_kernel(%arg0: i32, %arg1: memref<16x128xbf16, #tpu.memory_space<vmem>>, %arg2: memref<32x16xbf16, #tpu.memory_space<vmem>>, %arg3: memref<32x1xf32, #tpu.memory_space<vmem>>, %arg4: memref<32x32xbf16, #tpu.memory_space<vmem>>, %arg5: memref<32x1xf32, #tpu.memory_space<vmem>>, %arg6: memref<1x32xbf16, #tpu.memory_space<vmem>>, %arg7: memref<1x1xf32, #tpu.memory_space<vmem>>, %arg8: memref<1x128xf32, #tpu.memory_space<vmem>>) attributes {dimension_semantics = [#tpu.dimension_semantics<parallel>], iteration_bounds = array<i64: 1>, scalar_prefetch = 0 : i64, scratch_operands = 0 : i64, tpu.core_type = #tpu.core_type<tc>, window_params = [{transform_indices = @transform_0, window_bounds = array<i64: 16, 128>}, {pipeline_mode = #tpu.pipeline_mode<synchronous>, transform_indices = @transform_1, window_bounds = array<i64: 32, 16>}, {pipeline_mode = #tpu.pipeline_mode<synchronous>, transform_indices = @transform_2, window_bounds = array<i64: 32, 1>}, {pipeline_mode = #tpu.pipeline_mode<synchronous>, transform_indices = @transform_3, window_bounds = array<i64: 32, 32>}, {pipeline_mode = #tpu.pipeline_mode<synchronous>, transform_indices = @transform_4, window_bounds = array<i64: 32, 1>}, {pipeline_mode = #tpu.pipeline_mode<synchronous>, transform_indices = @transform_5, window_bounds = array<i64: 1, 32>}, {pipeline_mode = #tpu.pipeline_mode<synchronous>, transform_indices = @transform_6, window_bounds = array<i64: 1, 1>}, {transform_indices = @transform_7, window_bounds = array<i64: 1, 128>}]} {
    %c0 = arith.constant 0 : index
    %c0_0 = arith.constant 0 : index
    %0 = vector.load %arg2[%c0, %c0_0] : memref<32x16xbf16, #tpu.memory_space<vmem>>, vector<32x16xbf16>
    %c0_1 = arith.constant 0 : index
    %c0_2 = arith.constant 0 : index
    %1 = vector.load %arg1[%c0_1, %c0_2] : memref<16x128xbf16, #tpu.memory_space<vmem>>, vector<16x128xbf16>
    %cst = arith.constant dense<0.000000e+00> : vector<32x128xf32>
    %2 = tpu.matmul %0, %1, %cst {dimension_numbers = #tpu.dot_dimension_numbers<[1], [0], [0], [1], [0, 0, 1, 1], [], []>} : vector<32x16xbf16>, vector<16x128xbf16>, vector<32x128xf32> -> vector<32x128xf32>
    %c0_3 = arith.constant 0 : index
    %c0_4 = arith.constant 0 : index
    %3 = vector.load %arg3[%c0_3, %c0_4] : memref<32x1xf32, #tpu.memory_space<vmem>>, vector<32x1xf32>
    %4 = vector.broadcast %3 : vector<32x1xf32> to vector<32x128xf32>
    %5 = arith.addf %2, %4 : vector<32x128xf32>
    %6 = math.tanh %5 : vector<32x128xf32>
    %c0_5 = arith.constant 0 : index
    %c0_6 = arith.constant 0 : index
    %7 = vector.load %arg4[%c0_5, %c0_6] : memref<32x32xbf16, #tpu.memory_space<vmem>>, vector<32x32xbf16>
    %8 = arith.truncf %6 : vector<32x128xf32> to vector<32x128xbf16>
    %cst_7 = arith.constant dense<0.000000e+00> : vector<32x128xf32>
    %9 = tpu.matmul %7, %8, %cst_7 {dimension_numbers = #tpu.dot_dimension_numbers<[1], [0], [0], [1], [0, 0, 1, 1], [], []>} : vector<32x32xbf16>, vector<32x128xbf16>, vector<32x128xf32> -> vector<32x128xf32>
    %c0_8 = arith.constant 0 : index
    %c0_9 = arith.constant 0 : index
    %10 = vector.load %arg5[%c0_8, %c0_9] : memref<32x1xf32, #tpu.memory_space<vmem>>, vector<32x1xf32>
    %11 = vector.broadcast %10 : vector<32x1xf32> to vector<32x128xf32>
    %12 = arith.addf %9, %11 : vector<32x128xf32>
    %13 = math.tanh %12 : vector<32x128xf32>
    %c0_10 = arith.constant 0 : index
    %c0_11 = arith.constant 0 : index
    %14 = vector.load %arg6[%c0_10, %c0_11] : memref<1x32xbf16, #tpu.memory_space<vmem>>, vector<1x32xbf16>
    %15 = arith.truncf %13 : vector<32x128xf32> to vector<32x128xbf16>
    %cst_12 = arith.constant dense<0.000000e+00> : vector<1x128xf32>
    %16 = tpu.matmul %14, %15, %cst_12 {dimension_numbers = #tpu.dot_dimension_numbers<[1], [0], [0], [1], [0, 0, 1, 1], [], []>} : vector<1x32xbf16>, vector<32x128xbf16>, vector<1x128xf32> -> vector<1x128xf32>
    %c0_13 = arith.constant 0 : index
    %c0_14 = arith.constant 0 : index
    %17 = vector.load %arg7[%c0_13, %c0_14] : memref<1x1xf32, #tpu.memory_space<vmem>>, vector<1x1xf32>
    %18 = vector.broadcast %17 : vector<1x1xf32> to vector<1x128xf32>
    %19 = arith.addf %16, %18 : vector<1x128xf32>
    %c0_15 = arith.constant 0 : index
    %c0_16 = arith.constant 0 : index
    %20 = vector.load %arg8[%c0_15, %c0_16] : memref<1x128xf32, #tpu.memory_space<vmem>>, vector<1x128xf32>
    tpu.vector_store %arg8[%c0_15, %c0_16], %19 {strides = array<i32>} : memref<1x128xf32, #tpu.memory_space<vmem>>, vector<1x128xf32>,
    return
  }
  func.func @transform_0(%arg0: i32) -> (i32, i32) {
    %c0_i32 = arith.constant 0 : i32
    %c0_i32_0 = arith.constant 0 : i32
    return %c0_i32, %arg0 : i32, i32
  }
  func.func @transform_1(%arg0: i32) -> (i32, i32) {
    %c0_i32 = arith.constant 0 : i32
    %c0_i32_0 = arith.constant 0 : i32
    %c0_i32_1 = arith.constant 0 : i32
    return %c0_i32, %c0_i32_0 : i32, i32
  }
  func.func @transform_2(%arg0: i32) -> (i32, i32) {
    %c0_i32 = arith.constant 0 : i32
    %c0_i32_0 = arith.constant 0 : i32
    %c0_i32_1 = arith.constant 0 : i32
    return %c0_i32, %c0_i32_0 : i32, i32
  }
  func.func @transform_3(%arg0: i32) -> (i32, i32) {
    %c0_i32 = arith.constant 0 : i32
    %c0_i32_0 = arith.constant 0 : i32
    %c0_i32_1 = arith.constant 0 : i32
    return %c0_i32, %c0_i32_0 : i32, i32
  }
  func.func @transform_4(%arg0: i32) -> (i32, i32) {
    %c0_i32 = arith.constant 0 : i32
    %c0_i32_0 = arith.constant 0 : i32
    %c0_i32_1 = arith.constant 0 : i32
    return %c0_i32, %c0_i32_0 : i32, i32
  }
  func.func @transform_5(%arg0: i32) -> (i32, i32) {
    %c0_i32 = arith.constant 0 : i32
    %c0_i32_0 = arith.constant 0 : i32
    %c0_i32_1 = arith.constant 0 : i32
    return %c0_i32, %c0_i32_0 : i32, i32
  }
  func.func @transform_6(%arg0: i32) -> (i32, i32) {
    %c0_i32 = arith.constant 0 : i32
    %c0_i32_0 = arith.constant 0 : i32
    %c0_i32_1 = arith.constant 0 : i32
    return %c0_i32, %c0_i32_0 : i32, i32
  }
  func.func @transform_7(%arg0: i32) -> (i32, i32) {
    %c0_i32 = arith.constant 0 : i32
    %c0_i32_0 = arith.constant 0 : i32
    return %c0_i32, %arg0 : i32, i32
  }
}

</mosaic_0001>

<bundles_post_ra>
// kernel: mlp_critic_forward.1
= control target key start
LH: loop header
LB: loop body
LE: loop exit
PB: predicated region body
PF: predicated region fallthrough
CT: control target
= control target key end

     0   :  { %vm75_vm0 = vcmask 130048   ;;  %v364_v1 = vmov 0   ;;  %vm175_vm1 = vcmask 261120   ;;  %v365_v34 = vmov 0.0   ;;  %s460_s0 = inlined_call_operand.vmem [shape: bf16[16,128], index: 0, kind: input, shape index: {}]   ;;  %s461_s1 = inlined_call_operand.vmem [shape: bf16[32,16], index: 1, kind: input, shape index: {}]   ;;  %s462_s6 = inlined_call_operand.<no memory space> [shape: f32[1,1], index: 6, kind: input, shape index: {}]   ;;  %s463_s2 = inlined_call_operand.vmem [shape: f32[32,1], index: 2, kind: input, shape index: {}]   ;;  %s464_s4 = inlined_call_operand.vmem [shape: f32[32,1], index: 4, kind: input, shape index: {}]   ;;  %s465_s3 = inlined_call_operand.vmem [shape: bf16[32,32], index: 3, kind: input, shape index: {}]   ;;  %s466_s5 = inlined_call_operand.vmem [shape: bf16[1,32], index: 5, kind: input, shape index: {}]   ;;  %s467_s7 = inlined_call_operand.vmem [shape: f32[1,128], index: 7, kind: output, shape index: {}]  }
   0x1   :  { %v343_v0 = vld [vmem:[%s460_s0] sm:$0xff]   ;;  %341 = vset.pattern.permute.xlu0 %v364_v1  ;;  %342 = vset.pattern.permute.xlu1 %v364_v1  ;;  %v12_v2 = vstv %s462_s6  ;;  %v345_v4 = vld [vmem:[%s461_s1 + $0x8] sm:$0xff]   ;;  %v37_v5 = vld [vmem:[%s463_s2 + $0x10] sm:$0xff]  ;;  %vm366_vm2 = vmmov 0   ;;  %v244_v54 = vlaneseq }
   0x2   :  { %v344_v3 = vld [vmem:[%s461_s1] sm:$0xff]   ;;  %13 = vst [vmem:[#allocation2] sm:$0x1] %v12_v2  ;;  %316 = vmatprep.subr.bf16.mxu0 %v343_v0  ;;  %51 = vperm.xlu0 %341, %v37_v5   ;;  %v38_v7 = vld [vmem:[%s463_s2 + $0x18] sm:$0xff]  ;;  %v36_v8 = vld [vmem:[%s463_s2 + $0x8] sm:$0xff] }
   0x3   :  { %317 = vmatpush3.bf16.msra.mxu0 %v343_v0  ;;  %318 = vmatprep.mubr.msk.bf16.mxu0 %vm75_vm0, %v344_v3  ;;  %v35_v6 = vld [vmem:[%s463_s2] sm:$0xff]  ;;  %v143_v9 = vld [vmem:[%s464_s4 + $0x10] sm:$0xff]  ;;  %v144_v10 = vld [vmem:[%s464_s4 + $0x18] sm:$0xff]  ;;  %v245_v55 = vshrl.u32 %v244_v54, 7 }
   0x4   :  { %41 = vperm.xlu1 %342, %v35_v6   ;;  %v141_v11 = vld [vmem:[%s464_s4] sm:$0xff]  ;;  %v142_v12 = vld [vmem:[%s464_s4 + $0x8] sm:$0xff]  ;;  %330 = vmatprep.subr.bf16.mxu0 %v365_v34 }
   0x5   :  { %v346_v14 = vld [vmem:[%s465_s3] sm:$0xff]   ;;  %v347_v33 = vld [vmem:[%s465_s3 + $0x8] sm:$0xff]   ;;  %v246_v56 = vsub.s32 0, %v245_v55 }
   0x6   :  { %319 = vmatmul.mubr.msk.bf16.vlgmr.msra.gmra.mxu0 %vm75_vm0, %v345_v4  ;;  %56 = vperm.xlu0 %341, %v38_v7   ;;  %v235_v53 = vld [vmem:[%s466_s5] sm:$0x1] }
   0x7   :  { %326 = vmatprep.mubr.msk.bf16.mxu1 %vm175_vm1, %v346_v14  ;;  %334 = vmatprep.mubr.msk.bf16.mxu0 %vm366_vm2, %v365_v34 }
   0x8   :  { %46 = vperm.xlu1 %342, %v36_v8  }
   0x9   :  { %v238_v13 = vld [vmem:[#allocation2] sm:$0x1] }
   0xa   :  { %157 = vperm.xlu0 %341, %v143_v9  }
   0xc   :  { %162 = vperm.xlu1 %342, %v144_v10  }
   0xe   :  { %147 = vperm.xlu0 %341, %v141_v11  }
  0x10   :  { %152 = vperm.xlu1 %342, %v142_v12  }
  0x12   :  { %241 = vperm.xlu0 %341, %v238_v13  }
  0x7d   :  { %v52_v15 = vpop.permute.xlu0 %51 }
  0x7f   :  { %v42_v16 = vpop.permute.xlu1 %41 }
  0x81   :  { %v57_v20 = vpop.permute.xlu0 %56 }
  0x83   :  { %v47_v24 = vpop.permute.xlu1 %46 }
  0x85   :  { %v158_v35 = vpop.permute.xlu0 %157 }
  0x87   :  { %v163_v36 = vpop.permute.xlu1 %162 }
  0x89   :  { %v148_v41 = vpop.permute.xlu0 %147 }
  0x8b   :  { %v153_v43 = vpop.permute.xlu1 %152 }
  0x8d   :  { %v242_v57 = vpop.permute.xlu0 %241 }
  0x8e   :  { %v247_v58 = vrot.slane %v242_v57, %v246_v56 }
  0xc6   :  { %v320_v17 = vpop.f32.mrf.mxu0 }
  0xc7   :  { %v125_v18 = vadd.f32 %v320_v17, %v52_v15 }
  0xc8   :  { %v116_v19 = vpop.f32.mrf.mxu0 }
  0xc9   :  { %v117_v21 = vadd.f32 %v116_v19, %v42_v16  ;;  %348 = vtanh.f32 %v125_v18 }
  0xca   :  { %v321_v22 = vpop.f32.mrf.mxu0 }
  0xcb   :  { %v128_v23 = vadd.f32 %v321_v22, %v57_v20 }
  0xcc   :  { %v119_v25 = vpop.f32.mrf.mxu0 }
  0xcd   :  { %350 = vtanh.f32 %v128_v23  ;;  %v120_v26 = vadd.f32 %v119_v25, %v47_v24 }
  0xce   :  { %352 = vtanh.f32 %v117_v21 }
  0xcf   :  { %354 = vtanh.f32 %v120_v26 }
  0xd6   :  { %v349_v27 = vpop.eup %348 }
  0xda   :  { %v351_v28 = vpop.eup %350 }
  0xdb   :  { %v353_v29 = vpop.eup %352  ;;  %v140_v30 = vpack.c.bf16 %v351_v28, %v349_v27 }
  0xdc   :  { %v355_v31 = vpop.eup %354 }
  0xdd   :  { %322 = vmatprep.subr.bf16.mxu1 %v140_v30  ;;  %v139_v32 = vpack.c.bf16 %v355_v31, %v353_v29 }
  0xde   :  { %323 = vmatpush3.bf16.msra.mxu1 %v140_v30 }
  0xdf   :  { %324 = vmatprep.subr.bf16.mxu1 %v139_v32 }
  0xe2   :  { %325 = vmatpush3.bf16.msra.mxu1 %v139_v32 }
  0xe5   :  { %327 = vmatmul.mubr.msk.bf16.vlgmr.msra.gmra.mxu1 %vm175_vm1, %v347_v33 }
 0x1a5   :  { %v328_v37 = vpop.f32.mrf.mxu1 }
 0x1a6   :  { %v225_v38 = vadd.f32 %v328_v37, %v158_v35 }
 0x1a7   :  { %v216_v39 = vpop.f32.mrf.mxu1 }
 0x1a8   :  { %356 = vtanh.f32 %v225_v38  ;;  %v217_v45 = vadd.f32 %v216_v39, %v148_v41 }
 0x1a9   :  { %v329_v40 = vpop.f32.mrf.mxu1 }
 0x1aa   :  { %v228_v42 = vadd.f32 %v329_v40, %v163_v36 }
 0x1ab   :  { %v219_v44 = vpop.f32.mrf.mxu1 }
 0x1ac   :  { %358 = vtanh.f32 %v228_v42  ;;  %v220_v46 = vadd.f32 %v219_v44, %v153_v43 }
 0x1ae   :  { %360 = vtanh.f32 %v220_v46 }
 0x1af   :  { %362 = vtanh.f32 %v217_v45 }
 0x1b5   :  { %v357_v47 = vpop.eup %356 }
 0x1b9   :  { %v359_v48 = vpop.eup %358 }
 0x1ba   :  { %v237_v49 = vpack.c.bf16 %v359_v48, %v357_v47 }
 0x1bb   :  { %v361_v50 = vpop.eup %360 }
 0x1bc   :  { %331 = vmatpush3.bf16.msra.mxu0 %v237_v49  ;;  %v363_v51 = vpop.eup %362 }
 0x1bd   :  { %332 = vmatprep.subr.bf16.mxu0 %v365_v34  ;;  %v236_v52 = vpack.c.bf16 %v361_v50, %v363_v51 }
 0x1c0   :  { %333 = vmatpush3.bf16.msra.mxu0 %v236_v52 }
 0x1c3   :  { %335 = vmatmul.mubr.msk.bf16.vlgmr.msra.gmra.mxu0 %vm175_vm1, %v235_v53 }
 0x283   :  { %v285_v59 = vpop.f32.mrf.mxu0 }
 0x284   :  { %v286_v60 = vadd.f32 %v285_v59, %v247_v58 }
 0x285   :  { %v336_v61 = vpop.f32.mrf.mxu0 }
 0x286   :  { %291 = vst [vmem:[%s467_s7] sm:$0x1] %v286_v60 }
 0x287   :  { %v288_v62 = vpop.f32.mrf.mxu0 }
 0x289   :  { %v337_v63 = vpop.f32.mrf.mxu0 }

</bundles_post_ra>
